<compile_context>
chip_gen: v7x
topology: tpu7x:2x2x1
jax: 0.10.0
libtpu: 0.0.40
codegen_flags: <defaults>
</compile_context>

<pallas_src>
import functools

import jax
import jax.numpy as jnp
from jax import lax
from jax.experimental import pallas as pl
from jax.experimental.pallas import tpu as pltpu


def _round_up(n, m):
    return ((n + m - 1) // m) * m


# -----------------------------------------------------------------------------
# One-time parameter packing (call at init / after optimizer updates, NOT in
# the per-step hot path).
# -----------------------------------------------------------------------------
def pack_actor_params(w1, b1, w2, b2, *, actions, param_dtype=jnp.bfloat16):
    """Pack weights/biases into two lane-dense, MXU-friendly arrays.

    w1: [inp, hidden], b1: [hidden], w2: [hidden, 2*actions], b2: [2*actions]
    Returns:
      p1: [inp + 1, hidden_pad]  (last row is b1)
      p2: [hidden_pad + 1, n_pad] (last row is b2)
    hidden / 2*actions are zero-padded to a multiple of 128 lanes.
    """
    inp_size, hidden = w1.shape
    n_out = 2 * actions
    hidden_pad = max(128, _round_up(hidden, 128))
    n_pad = max(128, _round_up(n_out, 128))

    w1p = jnp.pad(w1, ((0, 0), (0, hidden_pad - hidden)))
    b1p = jnp.pad(b1, (0, hidden_pad - hidden))
    p1 = jnp.concatenate([w1p, b1p[None, :]], axis=0).astype(param_dtype)

    w2p = jnp.pad(w2, ((0, hidden_pad - hidden), (0, n_pad - n_out)))
    b2p = jnp.pad(b2, (0, n_pad - n_out))
    p2 = jnp.concatenate([w2p, b2p[None, :]], axis=0).astype(param_dtype)

    return p1, p2


# -----------------------------------------------------------------------------
# Kernel
# -----------------------------------------------------------------------------
def _actor_kernel(x_ref, p1_ref, p2_ref, out_ref, *,
                  inp_size, hidden_pad, actions, action_amp, pos_amp, pos_lo):
    # --- layer 1: h = sigmoid(x @ W1 + b1) -------------------------------
    x = x_ref[...].astype(jnp.bfloat16)               # [Bt, inp]   (MXU bf16)
    w1 = p1_ref[:inp_size, :]                         # [inp, Hp]   bf16
    b1 = p1_ref[inp_size:, :].astype(jnp.float32)     # [1,   Hp]
    h = jax.nn.sigmoid(
        jnp.dot(x, w1, preferred_element_type=jnp.float32) + b1)   # f32 [Bt,Hp]

    # --- layer 2: y = h @ W2 + b2 (output lanes padded to 128) -----------
    w2 = p2_ref[:hidden_pad, :]                        # [Hp, Np]   bf16
    b2 = p2_ref[hidden_pad:, :].astype(jnp.float32)    # [1,  Np]
    y = jnp.dot(h.astype(jnp.bfloat16), w2,
                preferred_element_type=jnp.float32) + b2            # f32 [Bt,Np]

    # --- output squash: single EUP pass via tanh(y) = 2*sigmoid(2y) - 1 ---
    # cols [0, actions)          -> tanh(y) * action_amp
    # cols [actions, 2*actions)  -> sigmoid(y) * pos_amp + pos_lo
    # cols >= 2*actions          -> padding junk, sliced off in wrapper
    col = lax.broadcasted_iota(jnp.int32, y.shape, 1)
    is_act = col < actions
    s = jax.nn.sigmoid(jnp.where(is_act, 2.0 * y, y))
    out_ref[...] = jnp.where(
        is_act,
        (2.0 * s - 1.0) * jnp.float32(action_amp),
        s * jnp.float32(pos_amp) + jnp.float32(pos_lo),
    )


# -----------------------------------------------------------------------------
# Jitted forward (hot path): no weight repacking, pre/post ops fused.
# -----------------------------------------------------------------------------
@functools.partial(jax.jit,
                   static_argnames=("actions", "bounds", "action_amp",
                                    "batch_tile"))
def actor_forward(state, p1, p2, *, actions, bounds, action_amp=1.0,
                  batch_tile=256):
    """Pallas-backed Actor.forward.

    state: [B, inp_size] f32
    p1, p2: pre-packed params from pack_actor_params.
    Returns (actions.squeeze(), positions.squeeze()) matching the torch module.
    """
    B, inp_size = state.shape
    assert p1.shape[0] == inp_size + 1, "p1 does not match state feature size"
    hidden_pad = p2.shape[0] - 1
    n_pad = p2.shape[1]
    n_out = 2 * actions
    pos_amp = float(bounds[1] - bounds[0])     # np.diff(bounds).item()
    pos_lo = float(bounds[0])

    # Batch tiling: a single full-array block at small B (exempt from the
    # (8,128) rule), a "parallel" grid over 256-row tiles at large B so v7x's
    # two TensorCores split the work and VMEM stays tiny.
    b_tile = B if B <= batch_tile else batch_tile
    grid = (pl.cdiv(B, b_tile),)

    kernel = functools.partial(
        _actor_kernel,
        inp_size=inp_size, hidden_pad=hidden_pad, actions=actions,
        action_amp=float(action_amp), pos_amp=pos_amp, pos_lo=pos_lo)

    out = pl.pallas_call(
        kernel,
        out_shape=jax.ShapeDtypeStruct((B, n_pad), jnp.float32),
        grid=grid,
        in_specs=[
            pl.BlockSpec((b_tile, inp_size), lambda i: (i, 0)),   # state tile
            pl.BlockSpec(p1.shape, lambda i: (0, 0)),             # [w1; b1]
            pl.BlockSpec(p2.shape, lambda i: (0, 0)),             # [w2; b2]
        ],
        out_specs=pl.BlockSpec((b_tile, n_pad), lambda i: (i, 0)),
        compiler_params=pltpu.CompilerParams(
            dimension_semantics=("parallel",)),
    )(state, p1, p2)

    act = out[:, :actions]
    pos = out[:, actions:n_out]
    # torch .squeeze() removes all size-1 dims (e.g. batch of 1 or actions==1).
    return jnp.squeeze(act), jnp.squeeze(pos)


# -----------------------------------------------------------------------------
# References
# -----------------------------------------------------------------------------
def _reference_forward_bf16(state, w1, b1, w2, b2, *, actions, bounds,
                            action_amp=1.0):
    # Mirrors the kernel math (bf16 matmul operands, f32 accumulation).
    bf = jnp.bfloat16
    h = jax.nn.sigmoid(
        jnp.dot(state.astype(bf), w1.astype(bf),
                preferred_element_type=jnp.float32)
        + b1.astype(bf).astype(jnp.float32))
    y = (jnp.dot(h.astype(bf), w2.astype(bf),
                 preferred_element_type=jnp.float32)
         + b2.astype(bf).astype(jnp.float32))
    a = jnp.tanh(y[:, :actions]) * action_amp
    p = jax.nn.sigmoid(y[:, actions:]) * (bounds[1] - bounds[0]) + bounds[0]
    return jnp.squeeze(a), jnp.squeeze(p)


def _reference_forward_f32(state, w1, b1, w2, b2, *, actions, bounds,
                           action_amp=1.0):
    # Pure-f32 torch-equivalent semantics check (loose tolerance vs bf16 MXU).
    h = jax.nn.sigmoid(state @ w1 + b1)
    y = h @ w2 + b2
    a = jnp.tanh(y[:, :actions]) * action_amp
    p = jax.nn.sigmoid(y[:, actions:]) * (bounds[1] - bounds[0]) + bounds[0]
    return jnp.squeeze(a), jnp.squeeze(p)


if __name__ == "__main__":
    # Small shapes consistent with the module: state is a flat feature vector.
    B = 2
    inp_size = 16
    hidden = 32
    actions = 4
    bounds = (-2.0, 2.0)
    action_amp = 1.0

    key = jax.random.PRNGKey(0)
    k_x, k_w1, k_b1, k_w2, k_b2 = jax.random.split(key, 5)

    # Deterministic synthetic parameters (uniform, PyTorch-Linear-style scale).
    lim1 = 1.0 / jnp.sqrt(inp_size)
    lim2 = 1.0 / jnp.sqrt(hidden)
    state = jax.random.normal(k_x, (B, inp_size), dtype=jnp.float32)
    w1 = jax.random.uniform(k_w1, (inp_size, hidden), jnp.float32, -lim1, lim1)
    b1 = jax.random.uniform(k_b1, (hidden,), jnp.float32, -lim1, lim1)
    w2 = jax.random.uniform(k_w2, (hidden, 2 * actions), jnp.float32, -lim2, lim2)
    b2 = jax.random.uniform(k_b2, (2 * actions,), jnp.float32, -lim2, lim2)

    # Pack once (init time), reuse every forward call.
    p1, p2 = pack_actor_params(w1, b1, w2, b2, actions=actions)

    act, pos = actor_forward(state, p1, p2,
                             actions=actions, bounds=bounds,
                             action_amp=action_amp)
    jax.block_until_ready((act, pos))

    ref_act, ref_pos = _reference_forward_bf16(
        state, w1, b1, w2, b2, actions=actions, bounds=bounds,
        action_amp=action_amp)
    f32_act, f32_pos = _reference_forward_f32(
        state, w1, b1, w2, b2, actions=actions, bounds=bounds,
        action_amp=action_amp)

    assert act.shape == ref_act.shape and pos.shape == ref_pos.shape
    # Tight check vs the bf16-mirrored reference (tanh rewrite is ~ulp level).
    assert jnp.allclose(act, ref_act, atol=5e-4), "actions mismatch (bf16 ref)"
    assert jnp.allclose(pos, ref_pos, atol=5e-4), "positions mismatch (bf16 ref)"
    # Loose semantics check vs full-f32 torch-equivalent math.
    assert jnp.allclose(act, f32_act, atol=5e-2), "actions mismatch (f32 ref)"
    assert jnp.allclose(pos, f32_pos, atol=5e-2), "positions mismatch (f32 ref)"

    print("KERNEL_OK")
</pallas_src>

<mosaic_0001>
module attributes {stable_mosaic.version = 11 : i64} {
  func.func @_actor_kernel(%arg0: i32, %arg1: memref<2x16xf32, #tpu.memory_space<vmem>>, %arg2: memref<17x128xbf16, #tpu.memory_space<vmem>>, %arg3: memref<129x128xbf16, #tpu.memory_space<vmem>>, %arg4: memref<2x128xf32, #tpu.memory_space<vmem>>) attributes {dimension_semantics = [#tpu.dimension_semantics<parallel>], iteration_bounds = array<i64: 1>, scalar_prefetch = 0 : i64, scratch_operands = 0 : i64, tpu.core_type = #tpu.core_type<tc>, window_params = [{transform_indices = @transform_0, window_bounds = array<i64: 2, 16>}, {pipeline_mode = #tpu.pipeline_mode<synchronous>, transform_indices = @transform_1, window_bounds = array<i64: 17, 128>}, {pipeline_mode = #tpu.pipeline_mode<synchronous>, transform_indices = @transform_2, window_bounds = array<i64: 129, 128>}, {transform_indices = @transform_3, window_bounds = array<i64: 2, 128>}]} {
    %c0 = arith.constant 0 : index
    %c0_0 = arith.constant 0 : index
    %0 = vector.load %arg1[%c0, %c0_0] : memref<2x16xf32, #tpu.memory_space<vmem>>, vector<2x16xf32>
    %1 = arith.truncf %0 : vector<2x16xf32> to vector<2x16xbf16>
    %c0_1 = arith.constant 0 : index
    %c0_2 = arith.constant 0 : index
    %2 = vector.load %arg2[%c0_1, %c0_2] : memref<17x128xbf16, #tpu.memory_space<vmem>>, vector<16x128xbf16>
    %c16 = arith.constant 16 : index
    %c0_3 = arith.constant 0 : index
    %3 = vector.load %arg2[%c16, %c0_3] : memref<17x128xbf16, #tpu.memory_space<vmem>>, vector<1x128xbf16>
    %4 = arith.extf %3 : vector<1x128xbf16> to vector<1x128xf32>
    %cst = arith.constant dense<0.000000e+00> : vector<2x128xf32>
    %5 = tpu.matmul %1, %2, %cst {dimension_numbers = #tpu.dot_dimension_numbers<[1], [0], [0], [1], [0, 0, 1, 1], [], []>} : vector<2x16xbf16>, vector<16x128xbf16>, vector<2x128xf32> -> vector<2x128xf32>
    %6 = vector.broadcast %4 : vector<1x128xf32> to vector<2x128xf32>
    %7 = arith.addf %5, %6 : vector<2x128xf32>
    %8 = arith.negf %7 : vector<2x128xf32>
    %9 = math.exp %8 : vector<2x128xf32>
    %cst_4 = arith.constant 1.000000e+00 : f32
    %10 = vector.broadcast %cst_4 : f32 to vector<2x128xf32>
    %11 = arith.addf %10, %9 : vector<2x128xf32>
    %12 = arith.divf %10, %11 : vector<2x128xf32>
    %c0_5 = arith.constant 0 : index
    %c0_6 = arith.constant 0 : index
    %13 = vector.load %arg3[%c0_5, %c0_6] : memref<129x128xbf16, #tpu.memory_space<vmem>>, vector<128x128xbf16>
    %c128 = arith.constant 128 : index
    %c0_7 = arith.constant 0 : index
    %14 = vector.load %arg3[%c128, %c0_7] : memref<129x128xbf16, #tpu.memory_space<vmem>>, vector<1x128xbf16>
    %15 = arith.extf %14 : vector<1x128xbf16> to vector<1x128xf32>
    %16 = arith.truncf %12 : vector<2x128xf32> to vector<2x128xbf16>
    %cst_8 = arith.constant dense<0.000000e+00> : vector<2x128xf32>
    %17 = tpu.matmul %16, %13, %cst_8 {dimension_numbers = #tpu.dot_dimension_numbers<[1], [0], [0], [1], [0, 0, 1, 1], [], []>} : vector<2x128xbf16>, vector<128x128xbf16>, vector<2x128xf32> -> vector<2x128xf32>
    %18 = vector.broadcast %15 : vector<1x128xf32> to vector<2x128xf32>
    %19 = arith.addf %17, %18 : vector<2x128xf32>
    %20 = tpu.iota {dimensions = array<i32: 1>} : vector<2x128xi32>
    %c4_i32 = arith.constant 4 : i32
    %21 = vector.broadcast %c4_i32 : i32 to vector<2x128xi32>
    %22 = arith.cmpi slt, %20, %21 : vector<2x128xi32>
    %cst_9 = arith.constant 2.000000e+00 : f32
    %23 = vector.broadcast %cst_9 : f32 to vector<2x128xf32>
    %24 = arith.mulf %23, %19 : vector<2x128xf32>
    %25 = arith.select %22, %24, %19 : vector<2x128xi1>, vector<2x128xf32>
    %26 = arith.negf %25 : vector<2x128xf32>
    %27 = math.exp %26 : vector<2x128xf32>
    %cst_10 = arith.constant 1.000000e+00 : f32
    %28 = vector.broadcast %cst_10 : f32 to vector<2x128xf32>
    %29 = arith.addf %28, %27 : vector<2x128xf32>
    %30 = arith.divf %28, %29 : vector<2x128xf32>
    %cst_11 = arith.constant 2.000000e+00 : f32
    %31 = vector.broadcast %cst_11 : f32 to vector<2x128xf32>
    %32 = arith.mulf %31, %30 : vector<2x128xf32>
    %cst_12 = arith.constant 1.000000e+00 : f32
    %33 = vector.broadcast %cst_12 : f32 to vector<2x128xf32>
    %34 = arith.subf %32, %33 : vector<2x128xf32>
    %cst_13 = arith.constant 1.000000e+00 : f32
    %35 = vector.broadcast %cst_13 : f32 to vector<2x128xf32>
    %36 = arith.mulf %34, %35 : vector<2x128xf32>
    %cst_14 = arith.constant 4.000000e+00 : f32
    %37 = vector.broadcast %cst_14 : f32 to vector<2x128xf32>
    %38 = arith.mulf %30, %37 : vector<2x128xf32>
    %cst_15 = arith.constant -2.000000e+00 : f32
    %39 = vector.broadcast %cst_15 : f32 to vector<2x128xf32>
    %40 = arith.addf %38, %39 : vector<2x128xf32>
    %41 = arith.select %22, %36, %40 : vector<2x128xi1>, vector<2x128xf32>
    %c0_16 = arith.constant 0 : index
    %c0_17 = arith.constant 0 : index
    %42 = vector.load %arg4[%c0_16, %c0_17] : memref<2x128xf32, #tpu.memory_space<vmem>>, vector<2x128xf32>
    tpu.vector_store %arg4[%c0_16, %c0_17], %41 {strides = array<i32>} : memref<2x128xf32, #tpu.memory_space<vmem>>, vector<2x128xf32>,
    return
  }
  func.func @transform_0(%arg0: i32) -> (i32, i32) {
    %c0_i32 = arith.constant 0 : i32
    %c0_i32_0 = arith.constant 0 : i32
    return %arg0, %c0_i32 : i32, i32
  }
  func.func @transform_1(%arg0: i32) -> (i32, i32) {
    %c0_i32 = arith.constant 0 : i32
    %c0_i32_0 = arith.constant 0 : i32
    %c0_i32_1 = arith.constant 0 : i32
    return %c0_i32, %c0_i32_0 : i32, i32
  }
  func.func @transform_2(%arg0: i32) -> (i32, i32) {
    %c0_i32 = arith.constant 0 : i32
    %c0_i32_0 = arith.constant 0 : i32
    %c0_i32_1 = arith.constant 0 : i32
    return %c0_i32, %c0_i32_0 : i32, i32
  }
  func.func @transform_3(%arg0: i32) -> (i32, i32) {
    %c0_i32 = arith.constant 0 : i32
    %c0_i32_0 = arith.constant 0 : i32
    return %arg0, %c0_i32 : i32, i32
  }
}

</mosaic_0001>

<bundles_post_ra>
// kernel: actor_forward.1
= control target key start
LH: loop header
LB: loop body
LE: loop exit
PB: predicated region body
PF: predicated region fallthrough
CT: control target
= control target key end

     0   :  { %8 = vsyncpa [#allocation3], 0  ;;  %s470_s0 = inlined_call_operand.hbm [shape: f32[2,16], index: 0, kind: input, shape index: {}]   ;;  %s471_s1 = inlined_call_operand.hbm [shape: bf16[17,128], index: 1, kind: input, shape index: {}]   ;;  %s472_s2 = inlined_call_operand.hbm [shape: bf16[129,128], index: 2, kind: input, shape index: {}]   ;;  %s473_s3 = inlined_call_operand.vmem [shape: f32[2,128], index: 3, kind: output, shape index: {}]  }
   0x1   :  { %9 = vsyncpa [#allocation5], 0  ;;  %s398_s12 = smov [#allocation4]   ;;  %s328_s16 = scalar_lea.hbm %s471_s1, 192 }
   0x2   :  { %s25_s13 = sshll.u32 %s398_s12, 4  ;;  %p329_p0 = scmp.ne.s32.totalorder %s471_s1, %s328_s16  ;;  %s26_s13 = int_to_ptr.vmem [resolvable:$true] %s25_s13 }
   0x3   :  { %p332_p1 = scmp.lt.u32.totalorder %s328_s16, %s471_s1 }
   0x5   :  { %p334_p2 = pnand %p332_p1, %p329_p0 }
   0x7   :  { %337 = shalt.err (!%p334_p2)
}
   0x8   :  { %s338_s21 = scalar_lea.vmem %s26_s13, 192  ;;  %p343_p4 = scmp.lt.s32.totalorder %s26_s13, %s26_s13 }
   0x9   :  { %p339_p3 = scmp.ne.s32.totalorder %s26_s13, %s338_s21  ;;  %p344_p5 = scmp.lt.s32.totalorder %s338_s21, %s338_s21 }
   0xb   :  { %p345_p6 = por %p344_p5, %p343_p4 }
   0xd   :  { %p346_p7 = pnand %p345_p6, %p339_p3 }
   0xf   :  { %349 = shalt.err (!%p346_p7)
}
  0x10   :  { %s399_s22 = smov 64   ;;  %s400_s23 = smov 4  }
  0x11   :  { %31 = dma.hbm_to_vmem [thread:$0]  %s471_s1, 192, %s26_s13, [#allocation5], %s399_s22, %s399_s22, %s400_s23  }
  0x12   :  { %s401_s26 = smov [#allocation2]   ;;  %s402_s28 = smov [#allocation6]  }
  0x13   :  { %s16_s27 = sshll.u32 %s401_s26, 4  ;;  %s37_s29 = sshll.u32 %s402_s28, 4  ;;  %s17_s27 = int_to_ptr.vmem [resolvable:$true] %s16_s27  ;;  %s38_s29 = int_to_ptr.vmem [resolvable:$true] %s37_s29 }
  0x14   :  { %s350_s5 = scalar_lea.hbm %s470_s0, 32 }
  0x15   :  { %p351_p8 = scmp.ne.s32.totalorder %s470_s0, %s350_s5  ;;  %p354_p9 = scmp.lt.u32.totalorder %s350_s5, %s470_s0 }
  0x17   :  { %p356_p10 = pnand %p354_p9, %p351_p8 }
  0x19   :  { %359 = shalt.err (!%p356_p10)
}
  0x1a   :  { %s360_s1 = scalar_lea.vmem %s17_s27, 32  ;;  %p365_p12 = scmp.lt.s32.totalorder %s17_s27, %s17_s27 }
  0x1b   :  { %p361_p11 = scmp.ne.s32.totalorder %s17_s27, %s360_s1  ;;  %p366_p13 = scmp.lt.s32.totalorder %s360_s1, %s360_s1 }
  0x1d   :  { %p367_p0 = por %p366_p13, %p365_p12 }
  0x1f   :  { %p368_p1 = pnand %p367_p0, %p361_p11 }
  0x21   :  { %371 = shalt.err (!%p368_p1)
}
  0x22   :  { %19 = dma.hbm_to_vmem [thread:$0]  %s470_s0, 32, %s17_s27, [#allocation3]  }
  0x23   :  { %s372_s14 = scalar_lea.hbm %s472_s2, 1088 }
  0x24   :  { %p373_p2 = scmp.ne.s32.totalorder %s472_s2, %s372_s14  ;;  %p376_p3 = scmp.lt.u32.totalorder %s372_s14, %s472_s2 }
  0x26   :  { %p378_p4 = pnand %p376_p3, %p373_p2 }
  0x28   :  { %381 = shalt.err (!%p378_p4)
}
  0x29   :  { %s382_s19 = scalar_lea.vmem %s38_s29, 1088  ;;  %p387_p6 = scmp.lt.s32.totalorder %s38_s29, %s38_s29 }
  0x2a   :  { %p383_p5 = scmp.ne.s32.totalorder %s38_s29, %s382_s19  ;;  %p388_p7 = scmp.lt.s32.totalorder %s382_s19, %s382_s19 }
  0x2c   :  { %p389_p8 = por %p388_p7, %p387_p6 }
  0x2e   :  { %p390_p9 = pnand %p389_p8, %p383_p5 }
  0x30   :  { %393 = shalt.err (!%p390_p9)
}
  0x31   :  { %43 = dma.hbm_to_vmem [thread:$0]  %s472_s2, 1088, %s38_s29, [#allocation5], %s399_s22, %s399_s22, %s400_s23  }
  0x32   :  { %394 = dma.done.wait [#allocation3], 32  }
  0x33   :  { %395 = vsyncadd [#allocation3], 4294967264 }
  0x34   :  { %396 = dma.done.wait [#allocation5], 1280  }
  0x35   :  { %397 = vsyncadd [#allocation5], 4294966016  ;;  %v403_v0 = vmov 0.0   ;;  %vm404_vm0 = vmmov 0   ;;  %v311_v1 = vld [vmem:[#allocation4] sm:$0xff]   ;;  %vm70_vm1 = vcmask 130048   ;;  %v60_v12 = vlaneseq }
  0x36   :  { %278 = vmatprep.subr.bf16.mxu0 %v403_v0  ;;  %280 = vmatprep.mubr.msk.bf16.mxu0 %vm404_vm0, %v403_v0  ;;  %v54_v2 = vld [vmem:[#allocation2] sm:$0x3]  ;;  %v312_v4 = vld [vmem:[#allocation6] sm:$0xff]   ;;  %v313_v5 = vld [vmem:[#allocation6 + $0x8] sm:$0xff]  }
  0x37   :  { %284 = vmatprep.subr.bf16.mxu1 %v403_v0  ;;  %300 = vmatprep.mubr.msk.bf16.mxu1 %vm404_vm0, %v403_v0  ;;  %v55_v3 = vpack.c.bf16 %v54_v2, %v54_v2  ;;  %v314_v6 = vld [vmem:[#allocation6 + $0x10] sm:$0xff]   ;;  %v315_v7 = vld [vmem:[#allocation6 + $0x18] sm:$0xff]   ;;  %v316_v8 = vld [vmem:[#allocation6 + $0x20] sm:$0xff]   ;;  %v61_v13 = vshrl.u32 %v60_v12, 7  ;;  %v232_v31 = vand.u32 127, %v60_v12 }
  0x38   :  { %279 = vmatpush3.bf16.msra.mxu0 %v311_v1  ;;  %285 = vmatpush3.bf16.msra.mxu1 %v312_v4  ;;  %v317_v9 = vld [vmem:[#allocation6 + $0x28] sm:$0xff]   ;;  %v318_v10 = vld [vmem:[#allocation6 + $0x30] sm:$0xff]   ;;  %v319_v11 = vld [vmem:[#allocation6 + $0x38] sm:$0xff]  }
  0x39   :  { %286 = vmatprep.subr.bf16.mxu1 %v403_v0  ;;  %v58_v14 = vld [vmem:[#allocation4 + $0x8] sm:$0x1]  ;;  %v62_v16 = vsub.s32 0, %v61_v13  ;;  %v136_v28 = vld [vmem:[#allocation6 + $0x40] sm:$0x1]  ;;  %vm233_vm2 = vcmp.lt.s32.totalorder %v232_v31, 4 }
  0x3a   :  { %v59_v15 = vunpack.c.l.bf16 %v58_v14  ;;  %v137_v29 = vunpack.c.l.bf16 %v136_v28 }
  0x3b   :  { %281 = vmatmul.mubr.msk.bf16.vlgmr.msra.gmra.mrb[0].mxu0 %vm70_vm1, %v55_v3 }
  0x3c   :  { %287 = vmatpush3.bf16.msra.mxu1 %v313_v5  ;;  %v63_v17 = vrot.slane %v59_v15, %v62_v16  ;;  %v142_v30 = vrot.slane %v137_v29, %v62_v16 }
  0x3d   :  { %288 = vmatprep.subr.bf16.mxu1 %v403_v0 }
  0x40   :  { %289 = vmatpush3.bf16.msra.mxu1 %v314_v6 }
  0x41   :  { %290 = vmatprep.subr.bf16.mxu1 %v403_v0 }
  0x44   :  { %291 = vmatpush3.bf16.msra.mxu1 %v315_v7 }
  0x45   :  { %292 = vmatprep.subr.bf16.mxu1 %v403_v0 }
  0x48   :  { %293 = vmatpush3.bf16.msra.mxu1 %v316_v8 }
  0x49   :  { %294 = vmatprep.subr.bf16.mxu1 %v403_v0 }
  0x4c   :  { %295 = vmatpush3.bf16.msra.mxu1 %v317_v9 }
  0x4d   :  { %296 = vmatprep.subr.bf16.mxu1 %v403_v0 }
  0x50   :  { %297 = vmatpush3.bf16.msra.mxu1 %v318_v10 }
  0x51   :  { %298 = vmatprep.subr.bf16.mxu1 %v403_v0 }
  0x54   :  { %299 = vmatpush3.bf16.msra.mxu1 %v319_v11 }
 0x10e   :  { %v108_v18 = vpop.f32.mrb[0].mxu0 }
 0x10f   :  { %v109_v19 = vadd.f32 %v108_v18, %v63_v17  ;;  %v282_v20 = vpop.f32.mrb[1].mxu0 }
 0x110   :  { %v111_v21 = vpop.f32.mrb[2].mxu0 }
 0x111   :  { %v256_v22 = vmul.f32 -1.442695, %v109_v19  ;;  %v283_v23 = vpop.f32.mrb[3].mxu0 }
 0x113   :  { %320 = vpow2.f32 %v256_v22 }
 0x11d   :  { %v321_v24 = vpop.eup %320 }
 0x11e   :  { %v117_v25 = vadd.f32 1.0, %v321_v24 }
 0x120   :  { %322 = vrcp.f32 %v117_v25 }
 0x12a   :  { %v323_v26 = vpop.eup %322 }
 0x12b   :  { %v138_v27 = vpack.c.bf16 %v323_v26, %v323_v26 }
 0x12d   :  { %301 = vmatmul.mubr.bf16.vlgmr.msra.gmra.mrb[0].mxu1 %v138_v27 }
 0x200   :  { %v225_v32 = vpop.f32.mrb[0].mxu1 }
 0x201   :  { %v226_v33 = vadd.f32 %v225_v32, %v142_v30  ;;  %v302_v34 = vpop.f32.mrb[1].mxu1 }
 0x202   :  { %v228_v35 = vpop.f32.mrb[2].mxu1 }
 0x203   :  { %v234_v36 = vmul.f32 2.0, %v226_v33  ;;  %v303_v37 = vpop.f32.mrb[3].mxu1 }
 0x205   :  { %v235_v38 = vsel %vm233_vm2, %v234_v36, %v226_v33 }
 0x206   :  { %v265_v39 = vmul.f32 -1.442695, %v235_v38 }
 0x208   :  { %324 = vpow2.f32 %v265_v39 }
 0x212   :  { %v325_v40 = vpop.eup %324 }
 0x213   :  { %v239_v41 = vadd.f32 1.0, %v325_v40 }
 0x215   :  { %326 = vrcp.f32 %v239_v41 }
 0x21f   :  { %v327_v42 = vpop.eup %326 }
 0x220   :  { %v242_v43 = vmul.f32 2.0, %v327_v42  ;;  %v244_v44 = vmul.f32 4.0, %v327_v42 }
 0x222   :  { %v266_v45 = vadd.f32 -1.0, %v242_v43  ;;  %v245_v46 = vadd.f32 -2.0, %v244_v44 }
 0x224   :  { %v246_v47 = vsel %vm233_vm2, %v266_v45, %v245_v46 }
 0x225   :  { %247 = vst [vmem:[%s473_s3] sm:$0x3] %v246_v47 }
 0x226   :  { %252 = vsyncpa [#allocation3], 1 }
 0x227   :  { %253 = vsyncpa [#allocation5], 1 }

</bundles_post_ra>
